<compile_context>
chip_gen: v5e
topology: v5e:2x2
jax: 0.10.0
libtpu: 0.0.40
codegen_flags: <defaults>
</compile_context>

<pallas_src>
import jax
import jax.numpy as jnp
from jax.experimental import pallas as pl
from jax.experimental.pallas import tpu as pltpu

HIDDEN = 128
SLAB_ROWS = 136  # rows 0:4 w1 | 4 b1 | 5 b23 | 8:136 w23 (128x128)


def _round_up(n, m):
    return ((n + m - 1) // m) * m


def policy_kernel(x_ref, slab_ref, out_ref):
    x = x_ref[...]                                # (TB, 4)

    # Static sub-views of the packed parameter slab (single DMA'd, grid-resident).
    w1 = slab_ref[0:4, :]                         # (4, 128)  affine1 weight (in, out)
    b1 = slab_ref[4:5, :]                         # (1, 128)  affine1 bias
    b23 = slab_ref[5:6, :]                        # (1, 128)  [b2(2), b3(1), zeros]
    w23 = slab_ref[8:8 + HIDDEN, :]               # (128,128) [W2(:, :2), W3(:, 2:3), zeros]

    # --- affine1: K=4 contraction done on the VPU (4 broadcast FMAs), MXU skipped ---
    h = b1 + x[:, 0:1] * w1[0:1, :]
    h = h + x[:, 1:2] * w1[1:2, :]
    h = h + x[:, 2:3] * w1[2:3, :]
    h = h + x[:, 3:4] * w1[3:4, :]
    h = jnp.maximum(h, 0.0)                       # ReLU (second F.relu is a no-op)

    # --- fused heads: one lane-dense MXU pass, cols 0-1 = action logits, col 2 = value ---
    z = jnp.dot(h, w23, preferred_element_type=jnp.float32) + b23   # (TB, 128)

    # Masked 2-way softmax over lanes 0-1, computed without lane extraction.
    lane = jax.lax.broadcasted_iota(jnp.int32, z.shape, dimension=1)
    is_logit = lane < 2
    zm = jnp.where(is_logit, z, -jnp.inf)
    m = jnp.max(zm, axis=-1, keepdims=True)
    e = jnp.exp(zm - m)                           # masked lanes -> exp(-inf) = 0
    s = jnp.sum(e, axis=-1, keepdims=True)        # >= 1, never zero
    r = pl.reciprocal(s, approx=True)             # EUP vrcp (otherwise idle slot)
    r = r * (2.0 - s * r)                         # one Newton step -> ~full f32 precision
    p = e * r

    # Single unmasked lane-dense store: probs in lanes 0-1, value in lane 2, zeros elsewhere.
    out_ref[...] = jnp.where(is_logit, p, z)


def policy_forward(x, slab, *, tb=512):
    """x: (B, 4) float32. slab: (136, 128) packed parameters (see pack_params)."""
    B = x.shape[0]
    if B <= tb:
        TB = _round_up(B, 8)      # single tile, sublane-aligned
        Bp = TB
    else:
        TB = tb                   # 512-row tiles: >=85% HBM roofline, fits v7x VMEM
        Bp = _round_up(B, TB)
    if Bp != B:
        x = jnp.pad(x, ((0, Bp - B), (0, 0)))

    out = pl.pallas_call(
        policy_kernel,
        out_shape=jax.ShapeDtypeStruct((Bp, HIDDEN), jnp.float32),
        grid_spec=pltpu.PrefetchScalarGridSpec(
            num_scalar_prefetch=0,
            grid=(Bp // TB,),
            in_specs=[
                pl.BlockSpec((TB, 4), lambda i: (i, 0)),            # batch-tiled input
                pl.BlockSpec((SLAB_ROWS, HIDDEN), lambda i: (0, 0)),  # slab resident across grid
            ],
            out_specs=pl.BlockSpec((TB, HIDDEN), lambda i: (i, 0)),
        ),
        compiler_params=pltpu.CompilerParams(
            dimension_semantics=("parallel",),        # megacore split of the batch axis
            vmem_limit_bytes=32 * 1024 * 1024,        # safe on v5e/v6e/v7x
        ),
    )(x, slab)

    action_prob = out[:B, 0:2]
    state_values = out[:B, 2:3]
    return action_prob, state_values


def init_params(key):
    """Deterministic synthetic init mirroring nn.Linear shapes (stored pre-transposed (in, out))."""
    k1, k2, k3, k4, k5, k6 = jax.random.split(key, 6)
    w1 = jax.random.uniform(k1, (4, HIDDEN), jnp.float32, -0.5, 0.5)   # affine1: Linear(4, 128)
    b1 = jax.random.uniform(k2, (1, HIDDEN), jnp.float32, -0.5, 0.5)
    w2 = jax.random.uniform(k3, (HIDDEN, 2), jnp.float32, -0.1, 0.1)   # action_head: Linear(128, 2)
    b2 = jax.random.uniform(k4, (1, 2), jnp.float32, -0.1, 0.1)
    w3 = jax.random.uniform(k5, (HIDDEN, 1), jnp.float32, -0.1, 0.1)   # value_head: Linear(128, 1)
    b3 = jax.random.uniform(k6, (1, 1), jnp.float32, -0.1, 0.1)
    return w1, b1, w2, b2, w3, b3


def pack_params(w1, b1, w2, b2, w3, b3):
    """Pack all parameters into one contiguous (136, 128) f32 slab (one DMA)."""
    w23 = jnp.zeros((HIDDEN, HIDDEN), jnp.float32)
    w23 = w23.at[:, 0:2].set(w2.astype(jnp.float32))
    w23 = w23.at[:, 2:3].set(w3.astype(jnp.float32))
    b23 = jnp.zeros((1, HIDDEN), jnp.float32)
    b23 = b23.at[:, 0:2].set(b2.astype(jnp.float32))
    b23 = b23.at[:, 2:3].set(b3.astype(jnp.float32))
    slab = jnp.zeros((SLAB_ROWS, HIDDEN), jnp.float32)
    slab = slab.at[0:4, :].set(w1.astype(jnp.float32))
    slab = slab.at[4:5, :].set(b1.astype(jnp.float32))
    slab = slab.at[5:6, :].set(b23)
    slab = slab.at[8:8 + HIDDEN, :].set(w23)
    return slab


if __name__ == "__main__":
    key = jax.random.PRNGKey(0)
    kx, kp = jax.random.split(key)

    B = 8  # small batch of CartPole-style observations
    x = jax.random.normal(kx, (B, 4), jnp.float32)
    params = init_params(kp)
    slab = pack_params(*params)

    action_prob, state_values = jax.block_until_ready(policy_forward(x, slab))

    # Reference check in plain JAX
    w1, b1, w2, b2, w3, b3 = params
    h_ref = jnp.maximum(x @ w1 + b1, 0.0)
    ap_ref = jax.nn.softmax(h_ref @ w2 + b2, axis=-1)
    sv_ref = h_ref @ w3 + b3

    assert action_prob.shape == (B, 2) and state_values.shape == (B, 1)
    assert jnp.allclose(action_prob, ap_ref, atol=1e-5)
    assert jnp.allclose(state_values, sv_ref, atol=1e-5)
    assert jnp.allclose(jnp.sum(action_prob, axis=-1), 1.0, atol=1e-5)

    # TODO(synk): surrogate_loss / discounted-reward bookkeeping is host-side episodic
    # training logic, not part of the forward pass, so it is intentionally not kernelized.
    print("KERNEL_OK")
</pallas_src>

<mosaic_0001>
module attributes {stable_mosaic.version = 11 : i64} {
  func.func @policy_kernel(%arg0: i32, %arg1: memref<8x4xf32, #tpu.memory_space<vmem>>, %arg2: memref<136x128xf32, #tpu.memory_space<vmem>>, %arg3: memref<8x128xf32, #tpu.memory_space<vmem>>) attributes {dimension_semantics = [#tpu.dimension_semantics<parallel>], iteration_bounds = array<i64: 1>, scalar_prefetch = 0 : i64, scratch_operands = 0 : i64, tpu.core_type = #tpu.core_type<tc>, window_params = [{transform_indices = @transform_0, window_bounds = array<i64: 8, 4>}, {pipeline_mode = #tpu.pipeline_mode<synchronous>, transform_indices = @transform_1, window_bounds = array<i64: 136, 128>}, {transform_indices = @transform_2, window_bounds = array<i64: 8, 128>}]} {
    %c0 = arith.constant 0 : index
    %c0_0 = arith.constant 0 : index
    %0 = vector.load %arg1[%c0, %c0_0] : memref<8x4xf32, #tpu.memory_space<vmem>>, vector<8x4xf32>
    %c0_1 = arith.constant 0 : index
    %c0_2 = arith.constant 0 : index
    %1 = vector.load %arg2[%c0_1, %c0_2] : memref<136x128xf32, #tpu.memory_space<vmem>>, vector<4x128xf32>
    %c4 = arith.constant 4 : index
    %c0_3 = arith.constant 0 : index
    %2 = vector.load %arg2[%c4, %c0_3] : memref<136x128xf32, #tpu.memory_space<vmem>>, vector<1x128xf32>
    %c5 = arith.constant 5 : index
    %c0_4 = arith.constant 0 : index
    %3 = vector.load %arg2[%c5, %c0_4] : memref<136x128xf32, #tpu.memory_space<vmem>>, vector<1x128xf32>
    %c8 = arith.constant 8 : index
    %c0_5 = arith.constant 0 : index
    %4 = vector.load %arg2[%c8, %c0_5] : memref<136x128xf32, #tpu.memory_space<vmem>>, vector<128x128xf32>
    %5 = vector.extract_strided_slice %0 {offsets = [0, 0], sizes = [8, 1], strides = [1, 1]} : vector<8x4xf32> to vector<8x1xf32>
    %6 = vector.extract_strided_slice %1 {offsets = [0, 0], sizes = [1, 128], strides = [1, 1]} : vector<4x128xf32> to vector<1x128xf32>
    %7 = vector.broadcast %5 : vector<8x1xf32> to vector<8x128xf32>
    %8 = vector.broadcast %6 : vector<1x128xf32> to vector<8x128xf32>
    %9 = arith.mulf %7, %8 : vector<8x128xf32>
    %10 = vector.broadcast %2 : vector<1x128xf32> to vector<8x128xf32>
    %11 = arith.addf %10, %9 : vector<8x128xf32>
    %12 = vector.extract_strided_slice %0 {offsets = [0, 1], sizes = [8, 1], strides = [1, 1]} : vector<8x4xf32> to vector<8x1xf32>
    %13 = vector.extract_strided_slice %1 {offsets = [1, 0], sizes = [1, 128], strides = [1, 1]} : vector<4x128xf32> to vector<1x128xf32>
    %14 = vector.broadcast %12 : vector<8x1xf32> to vector<8x128xf32>
    %15 = vector.broadcast %13 : vector<1x128xf32> to vector<8x128xf32>
    %16 = arith.mulf %14, %15 : vector<8x128xf32>
    %17 = arith.addf %11, %16 : vector<8x128xf32>
    %18 = vector.extract_strided_slice %0 {offsets = [0, 2], sizes = [8, 1], strides = [1, 1]} : vector<8x4xf32> to vector<8x1xf32>
    %19 = vector.extract_strided_slice %1 {offsets = [2, 0], sizes = [1, 128], strides = [1, 1]} : vector<4x128xf32> to vector<1x128xf32>
    %20 = vector.broadcast %18 : vector<8x1xf32> to vector<8x128xf32>
    %21 = vector.broadcast %19 : vector<1x128xf32> to vector<8x128xf32>
    %22 = arith.mulf %20, %21 : vector<8x128xf32>
    %23 = arith.addf %17, %22 : vector<8x128xf32>
    %24 = vector.extract_strided_slice %0 {offsets = [0, 3], sizes = [8, 1], strides = [1, 1]} : vector<8x4xf32> to vector<8x1xf32>
    %25 = vector.extract_strided_slice %1 {offsets = [3, 0], sizes = [1, 128], strides = [1, 1]} : vector<4x128xf32> to vector<1x128xf32>
    %26 = vector.broadcast %24 : vector<8x1xf32> to vector<8x128xf32>
    %27 = vector.broadcast %25 : vector<1x128xf32> to vector<8x128xf32>
    %28 = arith.mulf %26, %27 : vector<8x128xf32>
    %29 = arith.addf %23, %28 : vector<8x128xf32>
    %cst = arith.constant 0.000000e+00 : f32
    %30 = vector.broadcast %cst : f32 to vector<8x128xf32>
    %31 = arith.maximumf %29, %30 : vector<8x128xf32>
    %cst_6 = arith.constant dense<0.000000e+00> : vector<8x128xf32>
    %32 = tpu.matmul %31, %4, %cst_6 {dimension_numbers = #tpu.dot_dimension_numbers<[1], [0], [0], [1], [0, 0, 1, 1], [], []>} : vector<8x128xf32>, vector<128x128xf32>, vector<8x128xf32> -> vector<8x128xf32>
    %33 = vector.broadcast %3 : vector<1x128xf32> to vector<8x128xf32>
    %34 = arith.addf %32, %33 : vector<8x128xf32>
    %35 = tpu.iota {dimensions = array<i32: 1>} : vector<8x128xi32>
    %c2_i32 = arith.constant 2 : i32
    %36 = vector.broadcast %c2_i32 : i32 to vector<8x128xi32>
    %37 = arith.cmpi slt, %35, %36 : vector<8x128xi32>
    %cst_7 = arith.constant 0xFF800000 : f32
    %38 = vector.broadcast %cst_7 : f32 to vector<8x128xf32>
    %39 = arith.select %37, %34, %38 : vector<8x128xi1>, vector<8x128xf32>
    %cst_8 = arith.constant dense<0xFF800000> : vector<8xf32>
    %40 = vector.multi_reduction <maximumf>, %39, %cst_8 [1] : vector<8x128xf32> to vector<8xf32>
    %41 = vector.shape_cast %40 : vector<8xf32> to vector<8x1xf32>
    %42 = vector.broadcast %41 : vector<8x1xf32> to vector<8x128xf32>
    %43 = arith.subf %39, %42 : vector<8x128xf32>
    %44 = math.exp %43 : vector<8x128xf32>
    %cst_9 = arith.constant dense<0.000000e+00> : vector<8xf32>
    %45 = vector.multi_reduction <add>, %44, %cst_9 [1] : vector<8x128xf32> to vector<8xf32>
    %46 = vector.shape_cast %45 : vector<8xf32> to vector<8x1xf32>
    %47 = tpu.reciprocal %46 {approx = true} : vector<8x1xf32> -> vector<8x1xf32>
    %48 = arith.mulf %46, %47 : vector<8x1xf32>
    %cst_10 = arith.constant 2.000000e+00 : f32
    %49 = vector.broadcast %cst_10 : f32 to vector<8x1xf32>
    %50 = arith.subf %49, %48 : vector<8x1xf32>
    %51 = arith.mulf %47, %50 : vector<8x1xf32>
    %52 = vector.broadcast %51 : vector<8x1xf32> to vector<8x128xf32>
    %53 = arith.mulf %44, %52 : vector<8x128xf32>
    %54 = arith.select %37, %53, %34 : vector<8x128xi1>, vector<8x128xf32>
    %c0_11 = arith.constant 0 : index
    %c0_12 = arith.constant 0 : index
    %55 = vector.load %arg3[%c0_11, %c0_12] : memref<8x128xf32, #tpu.memory_space<vmem>>, vector<8x128xf32>
    tpu.vector_store %arg3[%c0_11, %c0_12], %54 {strides = array<i32>} : memref<8x128xf32, #tpu.memory_space<vmem>>, vector<8x128xf32>,
    return
  }
  func.func @transform_0(%arg0: i32) -> (i32, i32) {
    %c0_i32 = arith.constant 0 : i32
    %c0_i32_0 = arith.constant 0 : i32
    return %arg0, %c0_i32 : i32, i32
  }
  func.func @transform_1(%arg0: i32) -> (i32, i32) {
    %c0_i32 = arith.constant 0 : i32
    %c0_i32_0 = arith.constant 0 : i32
    %c0_i32_1 = arith.constant 0 : i32
    return %c0_i32, %c0_i32_0 : i32, i32
  }
  func.func @transform_2(%arg0: i32) -> (i32, i32) {
    %c0_i32 = arith.constant 0 : i32
    %c0_i32_0 = arith.constant 0 : i32
    return %arg0, %c0_i32 : i32, i32
  }
}

</mosaic_0001>

<bundles_post_ra>
// kernel: tpu_custom_call.1
= control target key start
LH: loop header
LB: loop body
LE: loop exit
PB: predicated region body
PF: predicated region fallthrough
CT: control target
= control target key end

     0   :  { %7 = vsyncpa [#allocation3], 0  ;;  %s240_s0 = inlined_call_operand.vmem [shape: f32[8,4], index: 0, kind: input, shape index: {}]   ;;  %s241_s1 = inlined_call_operand.hbm [shape: f32[136,128], index: 1, kind: input, shape index: {}]   ;;  %s242_s2 = inlined_call_operand.hbm [shape: f32[8,128], index: 2, kind: output, shape index: {}]  }
   0x1   :  { %8 = vsyncpa [#allocation4], 0  ;;  %s15_s11 = sshll.u32 %s241_s1, 4  ;;  %s206_s12 = smov [#allocation2]   ;;  %s16_s11 = int_to_ptr.hbm [resolvable:$true] %s15_s11 }
   0x2   :  { %s17_s13 = sshll.u32 %s206_s12, 4  ;;  %s207_s14 = smov 128   ;;  %s18_s13 = int_to_ptr.vmem [resolvable:$true] %s17_s13 }
   0x3   :  { %s208_s15 = smov 8  }
   0x4   :  { %23 = dma.hbm_to_vmem [thread:$0]  %s16_s11, 2176, %s18_s13, [#allocation3], %s207_s14, %s207_s14, %s208_s15  }
   0x5   :  { %202 = dma.done.wait [#allocation3], 2176  }
   0x6   :  { %203 = vsyncadd [#allocation3], 4294965120  ;;  %v209_v0 = vmov 0   ;;  %v210_v1 = vmov 2   ;;  %v28_v2 = vld [vmem:[%s240_s0] sm:$0xff]  ;;  %v46_v4 = vld [vmem:[#allocation2 + $0x78] sm:$0xff]  ;;  %v100_v40 = vlaneseq }
   0x7   :  { %143 = vset.pattern.permute.xlu0 %v209_v0  ;;  %145 = vset.pattern.permute.xlu1 %v210_v1  ;;  %v47_v3 = vld [vmem:[#allocation2 + $0x80] sm:$0xff]  ;;  %v45_v5 = vld [vmem:[#allocation2 + $0x70] sm:$0xff]  ;;  %v44_v6 = vld [vmem:[#allocation2 + $0x68] sm:$0xff]  ;;  %v211_v8 = vmov 1   ;;  %v212_v9 = vmov 3   ;;  %s213_s0 = smov [#allocation5]  }
   0x8   :  { %50 = vperm.xlu0 %143, %v28_v2   ;;  %65 = vperm.xlu1 %145, %v28_v2   ;;  %v43_v7 = vld [vmem:[#allocation2 + $0x60] sm:$0xff]  ;;  %v42_v10 = vld [vmem:[#allocation2 + $0x58] sm:$0xff]  ;;  %v41_v11 = vld [vmem:[#allocation2 + $0x50] sm:$0xff]  ;;  %v101_v41 = vand.u32 127, %v100_v40  ;;  %s123_s1 = sshll.u32 %s213_s0, 4  ;;  %s125_s20 = sshll.u32 %s242_s2, 4  ;;  %s124_s1 = int_to_ptr.vmem [resolvable:$true] %s123_s1  ;;  %s126_s20 = int_to_ptr.hbm [resolvable:$true] %s125_s20 }
   0x9   :  { %80 = vmatpush.msra.mxu0 %v47_v3  ;;  %v40_v12 = vld [vmem:[#allocation2 + $0x48] sm:$0xff]  ;;  %v39_v13 = vld [vmem:[#allocation2 + $0x40] sm:$0xff]  ;;  %v38_v14 = vld [vmem:[#allocation2 + $0x38] sm:$0xff] }
   0xa   :  { %v37_v15 = vld [vmem:[#allocation2 + $0x30] sm:$0xff]  ;;  %v36_v16 = vld [vmem:[#allocation2 + $0x28] sm:$0xff]  ;;  %v35_v17 = vld [vmem:[#allocation2 + $0x20] sm:$0xff]  ;;  %vm102_vm0 = vcmp.lt.s32.totalorder %v101_v41, 2 }
   0xb   :  { %81 = vmatpush.msra.mxu0 %v46_v4  ;;  %v34_v18 = vld [vmem:[#allocation2 + $0x18] sm:$0xff]  ;;  %v33_v19 = vld [vmem:[#allocation2 + $0x10] sm:$0xff]  ;;  %v32_v20 = vld [vmem:[#allocation2 + $0x8] sm:$0xff] }
   0xc   :  { %v29_v21 = vld [vmem:[#allocation2] sm:$0xf]  ;;  %v148_v25 = vld [vmem:[#allocation2 + $0x4] ss:$0 sm:$0xff]  ;;  %v149_v42 = vld [vmem:[#allocation2 + $0x5] ss:$0 sm:$0xff] }
   0xd   :  { %82 = vmatpush.msra.mxu0 %v45_v5  ;;  %v53_v24 = vperm.slane %v29_v21, 0  ;;  %v61_v27 = vperm.slane %v29_v21, 1  ;;  %v68_v28 = vperm.slane %v29_v21, 2  ;;  %v75_v29 = vperm.slane %v29_v21, 3 }
   0xf   :  { %83 = vmatpush.msra.mxu0 %v44_v6 }
  0x10   :  { %144 = vset.pattern.permute.xlu0 %v211_v8  ;;  %146 = vset.pattern.permute.xlu1 %v212_v9 }
  0x11   :  { %58 = vperm.xlu0 %144, %v28_v2   ;;  %72 = vperm.xlu1 %146, %v28_v2  }
  0x12   :  { %84 = vmatpush.msra.mxu0 %v43_v7 }
  0x14   :  { %85 = vmatpush.msra.mxu0 %v42_v10 }
  0x16   :  { %86 = vmatpush.msra.mxu0 %v41_v11 }
  0x18   :  { %87 = vmatpush.msra.mxu0 %v40_v12 }
  0x19   :  { %147 = vset.pattern.permute.xlu0 %v212_v9 }
  0x1a   :  { %88 = vmatpush.msra.mxu0 %v39_v13 }
  0x1c   :  { %89 = vmatpush.msra.mxu0 %v38_v14 }
  0x1e   :  { %90 = vmatpush.msra.mxu0 %v37_v15 }
  0x20   :  { %91 = vmatpush.msra.mxu0 %v36_v16 }
  0x22   :  { %92 = vmatpush.msra.mxu0 %v35_v17 }
  0x24   :  { %93 = vmatpush.msra.mxu0 %v34_v18 }
  0x26   :  { %94 = vmatpush.msra.mxu0 %v33_v19 }
  0x28   :  { %95 = vmatpush.msra.mxu0 %v32_v20 }
  0x7a   :  { %v51_v22 = vpop.permute.xlu0 %50  ;;  %v66_v23 = vpop.permute.xlu1 %65 }
  0x7b   :  { %v54_v26 = vmul.f32 %v53_v24, %v51_v22  ;;  %v69_v34 = vmul.f32 %v68_v28, %v66_v23 }
  0x7d   :  { %v56_v32 = vadd.f32 %v148_v25, %v54_v26 }
  0x83   :  { %v59_v30 = vpop.permute.xlu0 %58  ;;  %v73_v31 = vpop.permute.xlu1 %72 }
  0x84   :  { %v62_v33 = vmul.f32 %v61_v27, %v59_v30  ;;  %v76_v36 = vmul.f32 %v75_v29, %v73_v31 }
  0x86   :  { %v63_v35 = vadd.f32 %v62_v33, %v56_v32 }
  0x88   :  { %v70_v37 = vadd.f32 %v69_v34, %v63_v35 }
  0x8a   :  { %v77_v38 = vadd.f32 %v76_v36, %v70_v37 }
  0x8c   :  { %v78_v39 = vmax.f32 %v77_v38, 0.0 }
  0x8e   :  { %96 = vmatmul.f32.vlgmr.msra.gmra.mxu0 %v78_v39 }
 0x10b   :  { %v97_v43 = vpop.f32.mrf.mxu0 }
 0x10c   :  { %v98_v44 = vadd.f32 %v149_v42, %v97_v43 }
 0x10e   :  { %v103_v45 = vsel %vm102_vm0, %v98_v44, -inf }
 0x10f   :  { %104 = vmax.xlane.f32.xlu2 %v103_v45 }
 0x182   :  { %v105_v46 = vpop.xlane.xlu2 %104 }
 0x183   :  { %v106_v47 = vsub.f32 %v103_v45, %v105_v46 }
 0x185   :  { %v107_v48 = vmul.f32 1.442695, %v106_v47 }
 0x187   :  { %150 = vpow2.f32 %v107_v48 }
 0x18d   :  { %v151_v49 = vpop.eup %150 }
 0x18e   :  { %109 = vadd.xlane.f32.xlu2 %v151_v49 }
 0x201   :  { %v110_v50 = vpop.xlane.xlu2 %109 }
 0x202   :  { %152 = vrcp.f32 %v110_v50 }
 0x208   :  { %v153_v51 = vpop.eup %152 }
 0x209   :  { %v112_v52 = vmul.f32 %v153_v51, %v110_v50 }
 0x20b   :  { %v113_v53 = vsub.f32 2.0, %v112_v52 }
 0x20d   :  { %v114_v54 = vmul.f32 %v153_v51, %v113_v53 }
 0x20f   :  { %v115_v55 = vmul.f32 %v151_v49, %v114_v54 }
 0x211   :  { %v116_v56 = vsel %vm102_vm0, %v115_v55, %v98_v44 }
 0x212   :  { %117 = vst [vmem:[#allocation5] sm:$0xff] %v116_v56 }
 0x213   :  { %128 = dma.vmem_to_hbm [thread:$0]  %s124_s1, 128, %s126_s20, [#allocation4]  }
 0x214   :  { %204 = dma.done.wait [#allocation4], 128  }
 0x215   :  { %205 = vsyncadd [#allocation4], 4294967168 }
 0x216   :  { %133 = vsyncpa [#allocation3], 1 }
 0x217   :  { %134 = vsyncpa [#allocation4], 1 }

</bundles_post_ra>
